<compile_context>
chip_gen: v7x
topology: tpu7x:2x2x1
jax: 0.10.0
libtpu: 0.0.40
codegen_flags: <defaults>
</compile_context>

<pallas_src>
import math

import jax
import jax.numpy as jnp
from jax.experimental import pallas as pl
from jax.experimental.pallas import tpu as pltpu

TWO_PI = 2.0 * 3.14159265359   # same constant as the torch module
HALF_PI = math.pi / 2.0        # cos(x) == sin(x + pi/2)


def _rfe_kernel(t_ref, wseg_ref, bias_ref, o_ref):
    # t_ref:    (TBP, R)   -- R original timesteps per packed 128-lane row
    # wseg_ref: (R, PC)    -- block-diagonal [2*pi*w | 2*pi*w] pattern
    # bias_ref: (1, PC)    -- 0 on sin lanes, pi/2 on cos lanes
    # o_ref:    (TBP, PC)  -- lane-dense packed output
    t = t_ref[...]
    wseg = wseg_ref[...]
    R = wseg.shape[0]

    # phase[j, c] = t[j, c // D] * (2*pi * w[c % (D//2)]) + bias[c].
    # Block-diagonal pattern => exactly one nonzero product per lane (exact
    # f32), all at full 128-lane VPU density.  K == 1 per term, so no MXU.
    phase = t[:, 0:1] * wseg[0:1, :] + bias_ref[...]
    for r in range(1, R):
        phase = phase + t[:, r : r + 1] * wseg[r : r + 1, :]

    # Single sin polynomial per lane; cos half handled by the pi/2 bias.
    o_ref[...] = jnp.sin(phase).astype(o_ref.dtype)


def random_fourier_embedding(timesteps, w, *, tbp_rows=None, out_dtype=jnp.float32):
    """timesteps: (B,) float; w: (1, D/2) float -> (B, D) = [sin | cos]."""
    B = int(timesteps.shape[0])
    half = int(w.shape[1])
    D = 2 * half
    t = timesteps.astype(jnp.float32)
    w2pi = (w.astype(jnp.float32) * TWO_PI).reshape(1, half)

    # Lane packing: keep output last dim a multiple of 128 (unmasked vst).
    if D <= 128 and 128 % D == 0:
        R = 128 // D                       # pack R timesteps per output row
        packed_cols = R * D                # == 128
        pad_cols = 0
    else:
        R = 1                              # pad columns up to a 128 multiple
        packed_cols = ((D + 127) // 128) * 128
        pad_cols = packed_cols - D

    out_bytes = jnp.dtype(out_dtype).itemsize
    packed_rows_needed = pl.cdiv(B, R)

    # Packed-row tile: ~2 MiB of output per block (review target 2048-4096
    # rows at 128 lanes), but keep >= 2 blocks when there is enough work so
    # the "parallel" grid axis shards across both TensorCores on v7x.
    if tbp_rows is None:
        target = max(8, (((2 << 20) // (packed_cols * out_bytes)) // 8) * 8)
        half_work = max(8, ((pl.cdiv(packed_rows_needed, 2) + 7) // 8) * 8)
        tbp_rows = min(target, half_work)
    tbp_rows = max(8, (int(tbp_rows) // 8) * 8)    # sublane (8) rule

    n_blocks = pl.cdiv(packed_rows_needed, tbp_rows)
    packed_rows = n_blocks * tbp_rows
    B_pad = packed_rows * R

    # Pad the ragged tail with zeros (harmless; sliced off below).
    t_pad = jnp.zeros((B_pad,), jnp.float32).at[:B].set(t)
    t_packed = t_pad.reshape(packed_rows, R)

    # Host-side constants (hoisted out of the kernel):
    #   wseg[r, c] = 2*pi*w[c % half] if c // D == r else 0   (block diagonal)
    #   bias[c]    = 0 on sin lanes, pi/2 on cos lanes
    w_row = jnp.concatenate([w2pi, w2pi], axis=1)                   # (1, D)
    wseg = jnp.kron(jnp.eye(R, dtype=jnp.float32), w_row)           # (R, R*D)
    lane = jnp.arange(R * D) % D
    bias = jnp.where(lane >= half, jnp.float32(HALF_PI), jnp.float32(0.0))
    bias = bias.reshape(1, R * D)
    if pad_cols:
        wseg = jnp.pad(wseg, ((0, 0), (0, pad_cols)))
        bias = jnp.pad(bias, ((0, 0), (0, pad_cols)))

    # VMEM budget from the actual double-buffered footprint (+ slack);
    # v7x physical VMEM is only 64 MiB.
    block_bytes = (tbp_rows * packed_cols * out_bytes
                   + 4 * (tbp_rows * R + (R + 1) * packed_cols))
    vmem_limit = int(min(64 << 20, 2 * block_bytes + (4 << 20)))

    out_packed = pl.pallas_call(
        _rfe_kernel,
        out_shape=jax.ShapeDtypeStruct((packed_rows, packed_cols), out_dtype),
        grid_spec=pltpu.PrefetchScalarGridSpec(
            num_scalar_prefetch=0,
            grid=(n_blocks,),
            in_specs=[
                pl.BlockSpec((tbp_rows, R), lambda i: (i, 0)),
                pl.BlockSpec((R, packed_cols), lambda i: (0, 0)),
                pl.BlockSpec((1, packed_cols), lambda i: (0, 0)),
            ],
            out_specs=pl.BlockSpec((tbp_rows, packed_cols), lambda i: (i, 0)),
        ),
        compiler_params=pltpu.CompilerParams(
            dimension_semantics=("parallel",),
            vmem_limit_bytes=vmem_limit,
        ),
    )(t_packed, wseg, bias)

    if pad_cols == 0:
        # (packed_rows, R*D) row-major == (B_pad, D) row-major: free reshape.
        return out_packed.reshape(B_pad, D)[:B]
    return out_packed[:B, :D]


if __name__ == "__main__":
    embedding_dim = 32
    scale = 16.0
    batch = 8

    key = jax.random.PRNGKey(0)
    k_w, k_t = jax.random.split(key)

    # Deterministic "parameter" init, matching torch.randn(1, D/2) * scale.
    w = jax.random.normal(k_w, (1, embedding_dim // 2), dtype=jnp.float32) * scale
    timesteps = jax.random.uniform(k_t, (batch,), dtype=jnp.float32)

    out = jax.block_until_ready(random_fourier_embedding(timesteps, w))

    # Reference check (plain JAX), same math as the torch module.
    emb_ref = timesteps[:, None] * (w * TWO_PI)
    ref = jnp.concatenate([jnp.sin(emb_ref), jnp.cos(emb_ref)], axis=1)
    assert out.shape == (batch, embedding_dim)
    # cos(x) = sin(x + pi/2) rounds the argument once at ~ulp(|phase|)/2
    # (~1.5e-5 abs for |phase| up to a few hundred rad at scale=16), so the
    # comparison tolerance is 5e-5 instead of 1e-5.
    assert jnp.allclose(out, ref, atol=5e-5, rtol=1e-5)

    print("KERNEL_OK")
</pallas_src>

<mosaic_0001>
module attributes {stable_mosaic.version = 11 : i64} {
  func.func @_rfe_kernel(%arg0: i32, %arg1: memref<8x4xf32, #tpu.memory_space<vmem>>, %arg2: memref<4x128xf32, #tpu.memory_space<vmem>>, %arg3: memref<1x128xf32, #tpu.memory_space<vmem>>, %arg4: memref<8x128xf32, #tpu.memory_space<vmem>>) attributes {dimension_semantics = [#tpu.dimension_semantics<parallel>], iteration_bounds = array<i64: 1>, scalar_prefetch = 0 : i64, scratch_operands = 0 : i64, tpu.core_type = #tpu.core_type<tc>, window_params = [{transform_indices = @transform_0, window_bounds = array<i64: 8, 4>}, {pipeline_mode = #tpu.pipeline_mode<synchronous>, transform_indices = @transform_1, window_bounds = array<i64: 4, 128>}, {pipeline_mode = #tpu.pipeline_mode<synchronous>, transform_indices = @transform_2, window_bounds = array<i64: 1, 128>}, {transform_indices = @transform_3, window_bounds = array<i64: 8, 128>}]} {
    %c0 = arith.constant 0 : index
    %c0_0 = arith.constant 0 : index
    %0 = vector.load %arg1[%c0, %c0_0] : memref<8x4xf32, #tpu.memory_space<vmem>>, vector<8x4xf32>
    %c0_1 = arith.constant 0 : index
    %c0_2 = arith.constant 0 : index
    %1 = vector.load %arg2[%c0_1, %c0_2] : memref<4x128xf32, #tpu.memory_space<vmem>>, vector<4x128xf32>
    %2 = vector.extract_strided_slice %0 {offsets = [0, 0], sizes = [8, 1], strides = [1, 1]} : vector<8x4xf32> to vector<8x1xf32>
    %3 = vector.extract_strided_slice %1 {offsets = [0, 0], sizes = [1, 128], strides = [1, 1]} : vector<4x128xf32> to vector<1x128xf32>
    %4 = vector.broadcast %2 : vector<8x1xf32> to vector<8x128xf32>
    %5 = vector.broadcast %3 : vector<1x128xf32> to vector<8x128xf32>
    %6 = arith.mulf %4, %5 : vector<8x128xf32>
    %c0_3 = arith.constant 0 : index
    %c0_4 = arith.constant 0 : index
    %7 = vector.load %arg3[%c0_3, %c0_4] : memref<1x128xf32, #tpu.memory_space<vmem>>, vector<1x128xf32>
    %8 = vector.broadcast %7 : vector<1x128xf32> to vector<8x128xf32>
    %9 = arith.addf %6, %8 : vector<8x128xf32>
    %10 = vector.extract_strided_slice %0 {offsets = [0, 1], sizes = [8, 1], strides = [1, 1]} : vector<8x4xf32> to vector<8x1xf32>
    %11 = vector.extract_strided_slice %1 {offsets = [1, 0], sizes = [1, 128], strides = [1, 1]} : vector<4x128xf32> to vector<1x128xf32>
    %12 = vector.broadcast %10 : vector<8x1xf32> to vector<8x128xf32>
    %13 = vector.broadcast %11 : vector<1x128xf32> to vector<8x128xf32>
    %14 = arith.mulf %12, %13 : vector<8x128xf32>
    %15 = arith.addf %9, %14 : vector<8x128xf32>
    %16 = vector.extract_strided_slice %0 {offsets = [0, 2], sizes = [8, 1], strides = [1, 1]} : vector<8x4xf32> to vector<8x1xf32>
    %17 = vector.extract_strided_slice %1 {offsets = [2, 0], sizes = [1, 128], strides = [1, 1]} : vector<4x128xf32> to vector<1x128xf32>
    %18 = vector.broadcast %16 : vector<8x1xf32> to vector<8x128xf32>
    %19 = vector.broadcast %17 : vector<1x128xf32> to vector<8x128xf32>
    %20 = arith.mulf %18, %19 : vector<8x128xf32>
    %21 = arith.addf %15, %20 : vector<8x128xf32>
    %22 = vector.extract_strided_slice %0 {offsets = [0, 3], sizes = [8, 1], strides = [1, 1]} : vector<8x4xf32> to vector<8x1xf32>
    %23 = vector.extract_strided_slice %1 {offsets = [3, 0], sizes = [1, 128], strides = [1, 1]} : vector<4x128xf32> to vector<1x128xf32>
    %24 = vector.broadcast %22 : vector<8x1xf32> to vector<8x128xf32>
    %25 = vector.broadcast %23 : vector<1x128xf32> to vector<8x128xf32>
    %26 = arith.mulf %24, %25 : vector<8x128xf32>
    %27 = arith.addf %21, %26 : vector<8x128xf32>
    %28 = math.sin %27 : vector<8x128xf32>
    %c0_5 = arith.constant 0 : index
    %c0_6 = arith.constant 0 : index
    %29 = vector.load %arg4[%c0_5, %c0_6] : memref<8x128xf32, #tpu.memory_space<vmem>>, vector<8x128xf32>
    tpu.vector_store %arg4[%c0_5, %c0_6], %28 {strides = array<i32>} : memref<8x128xf32, #tpu.memory_space<vmem>>, vector<8x128xf32>,
    return
  }
  func.func @transform_0(%arg0: i32) -> (i32, i32) {
    %c0_i32 = arith.constant 0 : i32
    %c0_i32_0 = arith.constant 0 : i32
    return %arg0, %c0_i32 : i32, i32
  }
  func.func @transform_1(%arg0: i32) -> (i32, i32) {
    %c0_i32 = arith.constant 0 : i32
    %c0_i32_0 = arith.constant 0 : i32
    %c0_i32_1 = arith.constant 0 : i32
    return %c0_i32, %c0_i32_0 : i32, i32
  }
  func.func @transform_2(%arg0: i32) -> (i32, i32) {
    %c0_i32 = arith.constant 0 : i32
    %c0_i32_0 = arith.constant 0 : i32
    %c0_i32_1 = arith.constant 0 : i32
    return %c0_i32, %c0_i32_0 : i32, i32
  }
  func.func @transform_3(%arg0: i32) -> (i32, i32) {
    %c0_i32 = arith.constant 0 : i32
    %c0_i32_0 = arith.constant 0 : i32
    return %arg0, %c0_i32 : i32, i32
  }
}

</mosaic_0001>

<bundles_post_ra>
// kernel: tpu_custom_call.1
= control target key start
LH: loop header
LB: loop body
LE: loop exit
PB: predicated region body
PF: predicated region fallthrough
CT: control target
= control target key end

     0   :  { %v237_v1 = vmov 0   ;;  %v238_v2 = vmov 2   ;;  %s310_s0 = inlined_call_operand.vmem [shape: f32[8,4], index: 0, kind: input, shape index: {}]   ;;  %s311_s1 = inlined_call_operand.vmem [shape: f32[4,128], index: 1, kind: input, shape index: {}]   ;;  %s312_s2 = inlined_call_operand.vmem [shape: f32[1,128], index: 2, kind: input, shape index: {}]   ;;  %s313_s3 = inlined_call_operand.hbm [shape: f32[8,128], index: 3, kind: output, shape index: {}]  }
   0x1   :  { %v15_v0 = vld [vmem:[%s310_s0] sm:$0xff]  ;;  %204 = vset.pattern.permute.xlu0 %v237_v1  ;;  %206 = vset.pattern.permute.xlu1 %v238_v2 }
   0x2   :  { %8 = vsyncpa [#allocation3], 0  ;;  %19 = vperm.xlu0 %204, %v15_v0   ;;  %46 = vperm.xlu1 %206, %v15_v0   ;;  %v239_v3 = vmov 1   ;;  %v240_v4 = vmov 3   ;;  %v22_v5 = vlaneseq  ;;  %v16_v8 = vld [vmem:[%s311_s1] sm:$0xf] }
   0x3   :  { %v184_v17 = vld [vmem:[%s312_s2] ss:$0 sm:$0xff]  ;;  %v241_v40 = vmov 2102212464   ;;  %v242_v42 = vmov 920167782  }
   0x4   :  { %v23_v6 = vshrl.u32 %v22_v5, 7  ;;  %v243_v46 = vmov 1326507024   ;;  %v244_v48 = vmov 683565275   ;;  %s247_s1 = smov [#allocation2]  }
   0x5   :  { %v245_v50 = vmov 2475754826   ;;  %v246_v53 = vmov 2131351028   ;;  %s176_s2 = sshll.u32 %s247_s1, 4  ;;  %s177_s2 = int_to_ptr.vmem [resolvable:$true] %s176_s2 }
   0x6   :  { %205 = vset.pattern.permute.xlu0 %v239_v3  ;;  %207 = vset.pattern.permute.xlu1 %v240_v4  ;;  %v24_v7 = vsub.s32 0, %v23_v6  ;;  %v41_v10 = vsub.s32 1, %v23_v6  ;;  %v51_v12 = vsub.s32 2, %v23_v6  ;;  %v61_v14 = vsub.s32 3, %v23_v6  ;;  %s213_s17 = scalar_lea.vmem %s177_s2, 128  ;;  %p218_p1 = scmp.lt.s32.totalorder %s177_s2, %s177_s2 }
   0x7   :  { %36 = vperm.xlu0 %205, %v15_v0   ;;  %56 = vperm.xlu1 %207, %v15_v0   ;;  %p214_p0 = scmp.ne.s32.totalorder %s177_s2, %s213_s17  ;;  %p219_p2 = scmp.lt.s32.totalorder %s213_s17, %s213_s17 }
   0x8   :  { %v25_v9 = vrot.slane %v16_v8, %v24_v7  ;;  %v42_v16 = vrot.slane %v16_v8, %v41_v10  ;;  %v52_v18 = vrot.slane %v16_v8, %v51_v12  ;;  %v62_v19 = vrot.slane %v16_v8, %v61_v14 }
   0x9   :  { %p220_p3 = por %p219_p2, %p218_p1 }
   0xb   :  { %208 = vset.pattern.permute.xlu0 %v240_v4  ;;  %p221_p4 = pnand %p220_p3, %p214_p0 }
  0x81   :  { %v20_v11 = vpop.permute.xlu0 %19  ;;  %v47_v13 = vpop.permute.xlu1 %46 }
  0x82   :  { %v26_v15 = vmul.f32 %v25_v9, %v20_v11  ;;  %v53_v24 = vmul.f32 %v52_v18, %v47_v13 }
  0x84   :  { %v34_v22 = vadd.f32 %v184_v17, %v26_v15 }
  0x86   :  { %v37_v20 = vpop.permute.xlu0 %36  ;;  %v57_v21 = vpop.permute.xlu1 %56 }
  0x87   :  { %v43_v23 = vmul.f32 %v42_v16, %v37_v20  ;;  %v63_v26 = vmul.f32 %v62_v19, %v57_v21 }
  0x89   :  { %v44_v25 = vadd.f32 %v43_v23, %v34_v22 }
  0x8b   :  { %v54_v27 = vadd.f32 %v53_v24, %v44_v25 }
  0x8d   :  { %v277_v28 = vadd.f32 %v63_v26, %v54_v27 }
  0x8f   :  { %v68_v29 = vand.u32 2139095040, %v277_v28  ;;  %v65_v30 = vand.u32 2147483647, %v277_v28  ;;  %vm67_vm7 = vcmp.lt.s32.totalorder %v277_v28, 0  ;;  %vm157_vm12 = vweird.f32 %v277_v28 }
  0x91   :  { %v69_v31 = vshrl.u32 %v68_v29, 23  ;;  %v72_v33 = vand.u32 8388607, %v65_v30  ;;  %vm66_vm8 = vcmp.le.f32.partialorder %v65_v30, 0.7853982 }
  0x93   :  { %v185_v32 = vadd.s32 4294967169, %v69_v31  ;;  %v73_v36 = vor.u32 8388608, %v72_v33 }
  0x95   :  { %v75_v34 = vadd.s32 1, %v185_v32  ;;  %v113_v44 = vshll.u32 %v73_v36, 8 }
  0x97   :  { %vm76_vm0 = vcmp.gt.s32.totalorder %v75_v34, 0 }
  0x98   :  { %v77_v35 = vsel %vm76_vm0, %v75_v34, 0 }
  0x99   :  { %v79_v37 = vand.u32 31, %v77_v35  ;;  %v78_v38 = vshrl.u32 %v77_v35, 5 }
  0x9b   :  { %v80_v39 = vsub.s32 32, %v79_v37  ;;  %v91_v41 = vshll.u32 %v241_v40, %v79_v37  ;;  %v94_v43 = vshll.u32 %v242_v42, %v79_v37  ;;  %v82_v49 = vshll.u32 %v244_v48, %v79_v37 }
  0x9c   :  { %v85_v52 = vshll.u32 %v245_v50, %v79_v37  ;;  %v88_v55 = vshll.u32 %v246_v53, %v79_v37  ;;  %vm100_vm1 = vcmp.lt.s32.totalorder %v78_v38, 4  ;;  %vm97_vm2 = vcmp.lt.s32.totalorder %v78_v38, 1 }
  0x9d   :  { %v92_v45 = vshrl.u32 %v242_v42, %v80_v39  ;;  %v95_v47 = vshrl.u32 %v243_v46, %v80_v39  ;;  %v83_v51 = vshrl.u32 %v245_v50, %v80_v39  ;;  %v86_v54 = vshrl.u32 %v246_v53, %v80_v39 }
  0x9e   :  { %v89_v56 = vshrl.u32 %v241_v40, %v80_v39  ;;  %v81_v60 = vshrl.u32 %v244_v48, %v80_v39  ;;  %vm98_vm3 = vcmp.lt.s32.totalorder %v78_v38, 2  ;;  %vm99_vm4 = vcmp.lt.s32.totalorder %v78_v38, 3 }
  0x9f   :  { %v93_v57 = vor.u32 %v92_v45, %v91_v41  ;;  %v96_v58 = vor.u32 %v95_v47, %v94_v43  ;;  %v84_v59 = vor.u32 %v83_v51, %v82_v49  ;;  %v87_v61 = vor.u32 %v86_v54, %v85_v52 }
  0xa0   :  { %v90_v62 = vor.u32 %v89_v56, %v88_v55 }
  0xa1   :  { %v106_v63 = vsel %vm100_vm1, %v93_v57, 920167782  ;;  %v110_v0 = vsel %vm100_vm1, %v96_v58, 1326507024  ;;  %v105_v2 = vsel %vm97_vm2, %v84_v59, %v87_v61  ;;  %v101_v5 = vsel %vm97_vm2, %v81_v60, %v84_v59 }
  0xa2   :  { %v102_v1 = vsel %vm100_vm1, %v90_v62, 2102212464  ;;  %v107_v3 = vsel %vm99_vm4, %v90_v62, %v106_v63  ;;  %v109_v4 = vsel %vm97_vm2, %v87_v61, %v90_v62  ;;  %v111_v8 = vsel %vm99_vm4, %v93_v57, %v110_v0 }
  0xa3   :  { %v103_v6 = vsel %vm99_vm4, %v87_v61, %v102_v1  ;;  %v108_v7 = vsel %vm98_vm3, %v105_v2, %v107_v3  ;;  %v112_v9 = vsel %vm98_vm3, %v109_v4, %v111_v8 }
  0xa4   :  { %v283_v10 = vmul.u32.u64.low %v113_v44, %v108_v7  ;;  %v284_v11 = vmul.u32.u64.high %v113_v44, %v108_v7, %v283_v10  ;;  %v286_v12 = vmul.u32.u64.low %v113_v44, %v112_v9  ;;  %v287_v13 = vmul.u32.u64.high %v113_v44, %v112_v9, %v286_v12 }
  0xa5   :  { %v104_v14 = vsel %vm98_vm3, %v101_v5, %v103_v6 }
  0xa6   :  { %v123_v15 = vadd.s32 1, %v284_v11  ;;  %v120_v16 = vmul.u32 %v113_v44, %v104_v14  ;;  %vm122_vm5 = vc.u32 %v287_v13, %v283_v10  ;;  %v121_v29 = vadd.s32 %v283_v10, %v287_v13 }
  0xa8   :  { %v124_v17 = vsel %vm122_vm5, %v123_v15, %v284_v11 }
  0xa9   :  { %v125_v18 = vadd.s32 %v124_v17, %v120_v16 }
  0xab   :  { %v126_v19 = vadd.s32 536870912, %v125_v18 }
  0xad   :  { %v127_v20 = vshrl.u32 %v126_v19, 30 }
  0xaf   :  { %v128_v21 = vshll.u32 %v127_v20, 30  ;;  %v151_v42 = vsub.s32 4, %v127_v20 }
  0xb1   :  { %v129_v22 = vsub.s32 %v125_v18, %v128_v21  ;;  %v152_v45 = vsel %vm67_vm7, %v151_v42, %v127_v20 }
  0xb2   :  { %v154_v47 = vsel %vm66_vm8, 0, %v152_v45 }
  0xb3   :  { %v131_v23 = vsub.s32 0, %v129_v22  ;;  %v158_v48 = vadd.s32 3, %v154_v47 }
  0xb5   :  { %v186_v24 = vmin.u32 %v131_v23, %v129_v22  ;;  %v159_v49 = vand.u32 3, %v158_v48 }
  0xb7   :  { %v133_v25 = vclz %v186_v24  ;;  %vm164_vm9 = vcmp.eq.s32.totalorder %v159_v49, 2  ;;  %vm161_vm10 = vcmp.eq.s32.totalorder %v159_v49, 0  ;;  %vm160_vm11 = vcmp.lt.s32.totalorder %v159_v49, 2 }
  0xb9   :  { %v187_v26 = vadd.s32 4294967294, %v133_v25 }
  0xbb   :  { %vm188_vm6 = vcmp.lt.s32.totalorder %v187_v26, 0 }
  0xbc   :  { %v136_v27 = vsel %vm188_vm6, 0, %v187_v26 }
  0xbd   :  { %v137_v31 = vsub.s32 32, %v136_v27  ;;  %v141_v32 = vsub.s32 4294967266, %v136_v27  ;;  %v138_v33 = vshll.u32 %v129_v22, %v136_v27 }
  0xbf   :  { %v139_v34 = vshrl.u32 %v121_v29, %v137_v31  ;;  %v142_v35 = vadd.s32 127, %v141_v32 }
  0xc1   :  { %v140_v36 = vor.u32 %v139_v34, %v138_v33  ;;  %v143_v37 = vshll.u32 %v142_v35, 23 }
  0xc3   :  { %v144_v38 = vor.u32 4788187, %v143_v37  ;;  %v147_v40 = vcvt.s32.f32 %v140_v36 }
  0xc5   :  { %v145_v39 = vand.u32 2147483647, %v144_v38 }
  0xc7   :  { %v148_v41 = vmul.f32 %v147_v40, %v145_v39 }
  0xc9   :  { %v149_v43 = vxor.u32 2147483648, %v148_v41 }
  0xcb   :  { %v150_v44 = vsel %vm67_vm7, %v149_v43, %v148_v41 }
  0xcc   :  { %v153_v46 = vsel %vm66_vm8, %v277_v28, %v150_v44 }
  0xcd   :  { %209 = vcosq.f32 %v153_v46 }
  0xce   :  { %211 = vsinq.f32 %v153_v46 }
  0xd7   :  { %v210_v50 = vpop.eup %209 }
  0xd8   :  { %v212_v51 = vpop.eup %211  ;;  %v165_v52 = vxor.u32 2147483648, %v210_v50 }
  0xd9   :  { %v162_v53 = vxor.u32 2147483648, %v212_v51 }
  0xda   :  { %v166_v54 = vsel %vm164_vm9, %v165_v52, %v212_v51 }
  0xdb   :  { %v163_v30 = vsel %vm161_vm10, %v210_v50, %v162_v53 }
  0xdc   :  { %v167_v55 = vsel %vm160_vm11, %v163_v30, %v166_v54 }
  0xdd   :  { %v168_v56 = vsel %vm157_vm12, nan, %v167_v55 }
  0xde   :  { %169 = vst [vmem:[#allocation2] sm:$0xff] %v168_v56 }
  0xdf   :  { %224 = shalt.err (!%p221_p4)
}
  0xe0   :  { %s225_s20 = scalar_lea.hbm %s313_s3, 128 }
  0xe1   :  { %p226_p5 = scmp.ne.s32.totalorder %s313_s3, %s225_s20  ;;  %p229_p6 = scmp.lt.u32.totalorder %s225_s20, %s313_s3 }
  0xe3   :  { %p231_p7 = pnand %p229_p6, %p226_p5 }
  0xe5   :  { %234 = shalt.err (!%p231_p7)
}
  0xe6   :  { %179 = dma.vmem_to_hbm [thread:$0]  %s177_s2, 128, %s313_s3, [#allocation3]  }
  0xe7   :  { %235 = dma.done.wait [#allocation3], 128  }
  0xe8   :  { %236 = vsyncadd [#allocation3], 4294967168 }
  0xe9   :  { %183 = vsyncpa [#allocation3], 1 }

</bundles_post_ra>
